<compile_context>
chip_gen: v5e
topology: v5e:2x2
jax: 0.10.0
libtpu: 0.0.40
codegen_flags: <defaults>
</compile_context>

<pallas_src>
import functools

import jax
import jax.numpy as jnp
from jax import lax
from jax.experimental import pallas as pl
from jax.experimental.pallas import tpu as pltpu


def _resblock_kernel(x_ref, w1_ref, b1_ref, w2_ref, b2_ref, o_ref, pad_ref,
                     *, res_scale, neg_slope, H, WC):
    # x_ref:   (1, H, W*C)        input, lane-dense
    # w1/w2:   (3, W*C, W*C)      bf16 band matrices, one per ky tap row
    # b1/b2:   (1, W*C)           f32 bias tiled over W
    # o_ref:   (1, H, W*C)
    # pad_ref: VMEM (H+2, W*C) f32 scratch: row-padded x, then row-padded act.

    # Zero only the 2 halo rows (interior is fully overwritten each step, so no
    # full-buffer zero pass; re-done every step for megacore correctness).
    pad_ref[0:1, :] = jnp.zeros((1, WC), jnp.float32)
    pad_ref[H + 1:H + 2, :] = jnp.zeros((1, WC), jnp.float32)

    x = x_ref[0].astype(jnp.float32)       # (H, W*C)
    pad_ref[1:1 + H, :] = x                # row-padded input

    def conv3x3(wb_ref, bias_ref):
        acc = jnp.zeros((H, WC), jnp.float32)
        for ky in range(3):                # static unroll: 3 fat MXU matmuls
            lhs = pad_ref[ky:ky + H, :].astype(jnp.bfloat16)   # (H, W*C)
            acc = acc + jnp.dot(lhs, wb_ref[ky],
                                preferred_element_type=jnp.float32)
        return acc + bias_ref[...]         # (1, W*C) broadcast

    y = conv3x3(w1_ref, b1_ref)            # conv1 + bias
    y = jnp.maximum(y, neg_slope * y)      # LeakyReLU(0.1), f32 on VPU
    pad_ref[1:1 + H, :] = y                # reuse scratch as row-padded act
    y = conv3x3(w2_ref, b2_ref)            # conv2 + bias

    o_ref[0] = (x + res_scale * y).astype(o_ref.dtype)


def _band_weights(w_hwio, width):
    """(3, 3, Cin, Cout) HWIO conv weight -> (3, W*Cin, W*Cout) band matrices.

    Column ("SAME") padding is folded into the matrices by dropping the kx taps
    that would read outside [0, W):
        B[ky][(x+kx-1)*Cin + ci, x*Cout + co] = w[ky, kx, ci, co]
    so a padding=1 3x3 conv over W-flattened rows becomes
        out_row(y) = sum_ky padrow(y + ky) @ B[ky]      (rows zero-padded only).
    """
    _, _, cin, cout = w_hwio.shape
    bands = []
    for ky in range(3):
        b = jnp.zeros((width * cin, width * cout), w_hwio.dtype)
        for kx in range(3):
            place = jnp.eye(width, width, k=1 - kx, dtype=w_hwio.dtype)
            b = b + jnp.kron(place, w_hwio[ky, kx])
        bands.append(b)
    return jnp.stack(bands, axis=0)


def resblock_pallas(x_nhwc, w1_hwio, b1, w2_hwio, b2, *, res_scale=1.0,
                    neg_slope=0.1):
    """x_nhwc: (N,H,W,C); w*: (3,3,Cin,Cout) HWIO; b*: (C,). Returns (N,H,W,C)."""
    N, H, W, C = x_nhwc.shape
    WC = W * C

    w1b = _band_weights(w1_hwio, W).astype(jnp.bfloat16)
    w2b = _band_weights(w2_hwio, W).astype(jnp.bfloat16)
    b1f = jnp.tile(b1.astype(jnp.float32), W).reshape(1, WC)
    b2f = jnp.tile(b2.astype(jnp.float32), W).reshape(1, WC)

    # Lane-dense I/O: fold W into the lane dimension (layout plumbing only).
    x2d = x_nhwc.reshape(N, H, WC)

    kernel = functools.partial(_resblock_kernel, res_scale=float(res_scale),
                               neg_slope=float(neg_slope), H=H, WC=WC)

    flops = N * 2 * 3 * 2 * H * WC * WC           # 2 convs x 3 band matmuls
    bytes_accessed = (2 * x2d.size * x2d.dtype.itemsize
                      + w1b.size * w1b.dtype.itemsize
                      + w2b.size * w2b.dtype.itemsize
                      + b1f.size * b1f.dtype.itemsize
                      + b2f.size * b2f.dtype.itemsize)

    out2d = pl.pallas_call(
        kernel,
        out_shape=jax.ShapeDtypeStruct((N, H, WC), x_nhwc.dtype),
        grid_spec=pltpu.PrefetchScalarGridSpec(
            num_scalar_prefetch=0,
            grid=(N,),
            in_specs=[
                pl.BlockSpec((1, H, WC), lambda n: (n, 0, 0)),
                pl.BlockSpec((3, WC, WC), lambda n: (0, 0, 0)),
                pl.BlockSpec((1, WC), lambda n: (0, 0)),
                pl.BlockSpec((3, WC, WC), lambda n: (0, 0, 0)),
                pl.BlockSpec((1, WC), lambda n: (0, 0)),
            ],
            out_specs=pl.BlockSpec((1, H, WC), lambda n: (n, 0, 0)),
            scratch_shapes=[pltpu.VMEM((H + 2, WC), jnp.float32)],
        ),
        compiler_params=pltpu.CompilerParams(
            dimension_semantics=("parallel",)),
        cost_estimate=pl.CostEstimate(flops=flops, transcendentals=0,
                                      bytes_accessed=bytes_accessed),
    )(x2d, w1b, b1f, w2b, b2f)
    return out2d.reshape(N, H, W, C)


def _reference_nhwc(x_nhwc, w1, b1, w2, b2, res_scale=1.0, neg_slope=0.1):
    """Pure-JAX reference (lax conv) for a sanity check."""
    dn = lax.conv_dimension_numbers(x_nhwc.shape, w1.shape,
                                    ("NHWC", "HWIO", "NHWC"))
    y = lax.conv_general_dilated(x_nhwc, w1, (1, 1), "SAME",
                                 dimension_numbers=dn) + b1
    y = jnp.where(y >= 0, y, neg_slope * y)
    y = lax.conv_general_dilated(y, w2, (1, 1), "SAME",
                                 dimension_numbers=dn) + b2
    return x_nhwc + y * res_scale


if __name__ == "__main__":
    key = jax.random.PRNGKey(0)
    k_x, k_w1, k_w2 = jax.random.split(key, 3)

    # Small shapes consistent with the module (num_feat = C); W*C = 128.
    N, C, H, W = 2, 8, 16, 16

    # NCHW input (PyTorch convention) -> NHWC for the kernel.
    x_nchw = jax.random.normal(k_x, (N, C, H, W), dtype=jnp.float32)
    x_nhwc = jnp.transpose(x_nchw, (0, 2, 3, 1))

    # default_init_weights: kaiming_normal_ (fan_in=C*9, gain=sqrt(2)) * 0.1; bias=0.
    fan_in = C * 3 * 3
    std = (2.0 / fan_in) ** 0.5
    w1_oihw = jax.random.normal(k_w1, (C, C, 3, 3), jnp.float32) * std * 0.1
    w2_oihw = jax.random.normal(k_w2, (C, C, 3, 3), jnp.float32) * std * 0.1
    w1 = jnp.transpose(w1_oihw, (2, 3, 1, 0))   # (O,I,3,3) -> HWIO
    w2 = jnp.transpose(w2_oihw, (2, 3, 1, 0))
    b1 = jnp.zeros((C,), jnp.float32)
    b2 = jnp.zeros((C,), jnp.float32)

    res_scale = 1.0
    out_nhwc = resblock_pallas(x_nhwc, w1, b1, w2, b2, res_scale=res_scale)
    out_nhwc = jax.block_until_ready(out_nhwc)
    out_nchw = jnp.transpose(out_nhwc, (0, 3, 1, 2))    # back to PyTorch layout
    assert out_nchw.shape == (N, C, H, W)

    ref = _reference_nhwc(x_nhwc, w1, b1, w2, b2, res_scale=res_scale)
    err = float(jnp.max(jnp.abs(out_nhwc - ref)))
    # bf16 MXU operands with f32 accumulation -> ~1e-3 abs error at these scales.
    assert err < 2e-2, f"mismatch vs reference: max abs err {err}"

    print("KERNEL_OK")
</pallas_src>

<mosaic_0001>
module attributes {stable_mosaic.version = 11 : i64} {
  func.func @_resblock_kernel(%arg0: i32, %arg1: memref<1x16x128xf32, #tpu.memory_space<vmem>>, %arg2: memref<3x128x128xbf16, #tpu.memory_space<vmem>>, %arg3: memref<1x128xf32, #tpu.memory_space<vmem>>, %arg4: memref<3x128x128xbf16, #tpu.memory_space<vmem>>, %arg5: memref<1x128xf32, #tpu.memory_space<vmem>>, %arg6: memref<1x16x128xf32, #tpu.memory_space<vmem>>, %arg7: memref<18x128xf32, #tpu.memory_space<vmem>>) attributes {dimension_semantics = [#tpu.dimension_semantics<parallel>], iteration_bounds = array<i64: 2>, scalar_prefetch = 0 : i64, scratch_operands = 1 : i64, tpu.core_type = #tpu.core_type<tc>, window_params = [{transform_indices = @transform_0, window_bounds = array<i64: 1, 16, 128>}, {pipeline_mode = #tpu.pipeline_mode<synchronous>, transform_indices = @transform_1, window_bounds = array<i64: 3, 128, 128>}, {pipeline_mode = #tpu.pipeline_mode<synchronous>, transform_indices = @transform_2, window_bounds = array<i64: 1, 128>}, {pipeline_mode = #tpu.pipeline_mode<synchronous>, transform_indices = @transform_3, window_bounds = array<i64: 3, 128, 128>}, {pipeline_mode = #tpu.pipeline_mode<synchronous>, transform_indices = @transform_4, window_bounds = array<i64: 1, 128>}, {transform_indices = @transform_5, window_bounds = array<i64: 1, 16, 128>}]} {
    %cst = arith.constant 0.000000e+00 : f32
    %0 = vector.broadcast %cst : f32 to vector<1x128xf32>
    %c0 = arith.constant 0 : index
    %c0_0 = arith.constant 0 : index
    %1 = vector.load %arg7[%c0, %c0_0] : memref<18x128xf32, #tpu.memory_space<vmem>>, vector<1x128xf32>
    tpu.vector_store %arg7[%c0, %c0_0], %0 {strides = array<i32>} : memref<18x128xf32, #tpu.memory_space<vmem>>, vector<1x128xf32>,
    %cst_1 = arith.constant 0.000000e+00 : f32
    %2 = vector.broadcast %cst_1 : f32 to vector<1x128xf32>
    %c17 = arith.constant 17 : index
    %c0_2 = arith.constant 0 : index
    %3 = vector.load %arg7[%c17, %c0_2] : memref<18x128xf32, #tpu.memory_space<vmem>>, vector<1x128xf32>
    tpu.vector_store %arg7[%c17, %c0_2], %2 {strides = array<i32>} : memref<18x128xf32, #tpu.memory_space<vmem>>, vector<1x128xf32>,
    %c0_3 = arith.constant 0 : index
    %c0_4 = arith.constant 0 : index
    %c0_5 = arith.constant 0 : index
    %4 = vector.load %arg1[%c0_3, %c0_4, %c0_5] : memref<1x16x128xf32, #tpu.memory_space<vmem>>, vector<1x16x128xf32>
    %5 = vector.shape_cast %4 : vector<1x16x128xf32> to vector<16x128xf32>
    %c1 = arith.constant 1 : index
    %c0_6 = arith.constant 0 : index
    %6 = vector.load %arg7[%c1, %c0_6] : memref<18x128xf32, #tpu.memory_space<vmem>>, vector<16x128xf32>
    tpu.vector_store %arg7[%c1, %c0_6], %5 {strides = array<i32>} : memref<18x128xf32, #tpu.memory_space<vmem>>, vector<16x128xf32>,
    %cst_7 = arith.constant 0.000000e+00 : f32
    %7 = vector.broadcast %cst_7 : f32 to vector<16x128xf32>
    %c0_8 = arith.constant 0 : index
    %c0_9 = arith.constant 0 : index
    %8 = vector.load %arg7[%c0_8, %c0_9] : memref<18x128xf32, #tpu.memory_space<vmem>>, vector<16x128xf32>
    %9 = arith.truncf %8 : vector<16x128xf32> to vector<16x128xbf16>
    %c0_10 = arith.constant 0 : index
    %c0_11 = arith.constant 0 : index
    %c0_12 = arith.constant 0 : index
    %10 = vector.load %arg2[%c0_10, %c0_11, %c0_12] : memref<3x128x128xbf16, #tpu.memory_space<vmem>>, vector<1x128x128xbf16>
    %11 = vector.shape_cast %10 : vector<1x128x128xbf16> to vector<128x128xbf16>
    %cst_13 = arith.constant dense<0.000000e+00> : vector<16x128xf32>
    %12 = tpu.matmul %9, %11, %cst_13 {dimension_numbers = #tpu.dot_dimension_numbers<[1], [0], [0], [1], [0, 0, 1, 1], [], []>} : vector<16x128xbf16>, vector<128x128xbf16>, vector<16x128xf32> -> vector<16x128xf32>
    %13 = arith.addf %7, %12 : vector<16x128xf32>
    %c1_14 = arith.constant 1 : index
    %c0_15 = arith.constant 0 : index
    %14 = vector.load %arg7[%c1_14, %c0_15] : memref<18x128xf32, #tpu.memory_space<vmem>>, vector<16x128xf32>
    %15 = arith.truncf %14 : vector<16x128xf32> to vector<16x128xbf16>
    %c1_16 = arith.constant 1 : index
    %c0_17 = arith.constant 0 : index
    %c0_18 = arith.constant 0 : index
    %16 = vector.load %arg2[%c1_16, %c0_17, %c0_18] : memref<3x128x128xbf16, #tpu.memory_space<vmem>>, vector<1x128x128xbf16>
    %17 = vector.shape_cast %16 : vector<1x128x128xbf16> to vector<128x128xbf16>
    %cst_19 = arith.constant dense<0.000000e+00> : vector<16x128xf32>
    %18 = tpu.matmul %15, %17, %cst_19 {dimension_numbers = #tpu.dot_dimension_numbers<[1], [0], [0], [1], [0, 0, 1, 1], [], []>} : vector<16x128xbf16>, vector<128x128xbf16>, vector<16x128xf32> -> vector<16x128xf32>
    %19 = arith.addf %13, %18 : vector<16x128xf32>
    %c2 = arith.constant 2 : index
    %c0_20 = arith.constant 0 : index
    %20 = vector.load %arg7[%c2, %c0_20] : memref<18x128xf32, #tpu.memory_space<vmem>>, vector<16x128xf32>
    %21 = arith.truncf %20 : vector<16x128xf32> to vector<16x128xbf16>
    %c2_21 = arith.constant 2 : index
    %c0_22 = arith.constant 0 : index
    %c0_23 = arith.constant 0 : index
    %22 = vector.load %arg2[%c2_21, %c0_22, %c0_23] : memref<3x128x128xbf16, #tpu.memory_space<vmem>>, vector<1x128x128xbf16>
    %23 = vector.shape_cast %22 : vector<1x128x128xbf16> to vector<128x128xbf16>
    %cst_24 = arith.constant dense<0.000000e+00> : vector<16x128xf32>
    %24 = tpu.matmul %21, %23, %cst_24 {dimension_numbers = #tpu.dot_dimension_numbers<[1], [0], [0], [1], [0, 0, 1, 1], [], []>} : vector<16x128xbf16>, vector<128x128xbf16>, vector<16x128xf32> -> vector<16x128xf32>
    %25 = arith.addf %19, %24 : vector<16x128xf32>
    %c0_25 = arith.constant 0 : index
    %c0_26 = arith.constant 0 : index
    %26 = vector.load %arg3[%c0_25, %c0_26] : memref<1x128xf32, #tpu.memory_space<vmem>>, vector<1x128xf32>
    %27 = vector.broadcast %26 : vector<1x128xf32> to vector<16x128xf32>
    %28 = arith.addf %25, %27 : vector<16x128xf32>
    %cst_27 = arith.constant 1.000000e-01 : f32
    %29 = vector.broadcast %cst_27 : f32 to vector<16x128xf32>
    %30 = arith.mulf %29, %28 : vector<16x128xf32>
    %31 = arith.maximumf %28, %30 : vector<16x128xf32>
    %c1_28 = arith.constant 1 : index
    %c0_29 = arith.constant 0 : index
    %32 = vector.load %arg7[%c1_28, %c0_29] : memref<18x128xf32, #tpu.memory_space<vmem>>, vector<16x128xf32>
    tpu.vector_store %arg7[%c1_28, %c0_29], %31 {strides = array<i32>} : memref<18x128xf32, #tpu.memory_space<vmem>>, vector<16x128xf32>,
    %cst_30 = arith.constant 0.000000e+00 : f32
    %33 = vector.broadcast %cst_30 : f32 to vector<16x128xf32>
    %c0_31 = arith.constant 0 : index
    %c0_32 = arith.constant 0 : index
    %34 = vector.load %arg7[%c0_31, %c0_32] : memref<18x128xf32, #tpu.memory_space<vmem>>, vector<16x128xf32>
    %35 = arith.truncf %34 : vector<16x128xf32> to vector<16x128xbf16>
    %c0_33 = arith.constant 0 : index
    %c0_34 = arith.constant 0 : index
    %c0_35 = arith.constant 0 : index
    %36 = vector.load %arg4[%c0_33, %c0_34, %c0_35] : memref<3x128x128xbf16, #tpu.memory_space<vmem>>, vector<1x128x128xbf16>
    %37 = vector.shape_cast %36 : vector<1x128x128xbf16> to vector<128x128xbf16>
    %cst_36 = arith.constant dense<0.000000e+00> : vector<16x128xf32>
    %38 = tpu.matmul %35, %37, %cst_36 {dimension_numbers = #tpu.dot_dimension_numbers<[1], [0], [0], [1], [0, 0, 1, 1], [], []>} : vector<16x128xbf16>, vector<128x128xbf16>, vector<16x128xf32> -> vector<16x128xf32>
    %39 = arith.addf %33, %38 : vector<16x128xf32>
    %c1_37 = arith.constant 1 : index
    %c0_38 = arith.constant 0 : index
    %40 = vector.load %arg7[%c1_37, %c0_38] : memref<18x128xf32, #tpu.memory_space<vmem>>, vector<16x128xf32>
    %41 = arith.truncf %40 : vector<16x128xf32> to vector<16x128xbf16>
    %c1_39 = arith.constant 1 : index
    %c0_40 = arith.constant 0 : index
    %c0_41 = arith.constant 0 : index
    %42 = vector.load %arg4[%c1_39, %c0_40, %c0_41] : memref<3x128x128xbf16, #tpu.memory_space<vmem>>, vector<1x128x128xbf16>
    %43 = vector.shape_cast %42 : vector<1x128x128xbf16> to vector<128x128xbf16>
    %cst_42 = arith.constant dense<0.000000e+00> : vector<16x128xf32>
    %44 = tpu.matmul %41, %43, %cst_42 {dimension_numbers = #tpu.dot_dimension_numbers<[1], [0], [0], [1], [0, 0, 1, 1], [], []>} : vector<16x128xbf16>, vector<128x128xbf16>, vector<16x128xf32> -> vector<16x128xf32>
    %45 = arith.addf %39, %44 : vector<16x128xf32>
    %c2_43 = arith.constant 2 : index
    %c0_44 = arith.constant 0 : index
    %46 = vector.load %arg7[%c2_43, %c0_44] : memref<18x128xf32, #tpu.memory_space<vmem>>, vector<16x128xf32>
    %47 = arith.truncf %46 : vector<16x128xf32> to vector<16x128xbf16>
    %c2_45 = arith.constant 2 : index
    %c0_46 = arith.constant 0 : index
    %c0_47 = arith.constant 0 : index
    %48 = vector.load %arg4[%c2_45, %c0_46, %c0_47] : memref<3x128x128xbf16, #tpu.memory_space<vmem>>, vector<1x128x128xbf16>
    %49 = vector.shape_cast %48 : vector<1x128x128xbf16> to vector<128x128xbf16>
    %cst_48 = arith.constant dense<0.000000e+00> : vector<16x128xf32>
    %50 = tpu.matmul %47, %49, %cst_48 {dimension_numbers = #tpu.dot_dimension_numbers<[1], [0], [0], [1], [0, 0, 1, 1], [], []>} : vector<16x128xbf16>, vector<128x128xbf16>, vector<16x128xf32> -> vector<16x128xf32>
    %51 = arith.addf %45, %50 : vector<16x128xf32>
    %c0_49 = arith.constant 0 : index
    %c0_50 = arith.constant 0 : index
    %52 = vector.load %arg5[%c0_49, %c0_50] : memref<1x128xf32, #tpu.memory_space<vmem>>, vector<1x128xf32>
    %53 = vector.broadcast %52 : vector<1x128xf32> to vector<16x128xf32>
    %54 = arith.addf %51, %53 : vector<16x128xf32>
    %cst_51 = arith.constant 1.000000e+00 : f32
    %55 = vector.broadcast %cst_51 : f32 to vector<16x128xf32>
    %56 = arith.mulf %55, %54 : vector<16x128xf32>
    %57 = arith.addf %5, %56 : vector<16x128xf32>
    %c0_52 = arith.constant 0 : index
    %c0_53 = arith.constant 0 : index
    %c0_54 = arith.constant 0 : index
    %58 = vector.load %arg6[%c0_52, %c0_53, %c0_54] : memref<1x16x128xf32, #tpu.memory_space<vmem>>, vector<1x16x128xf32>
    %59 = vector.shape_cast %58 : vector<1x16x128xf32> to vector<16x128xf32>
    %60 = vector.shape_cast %57 : vector<16x128xf32> to vector<1x16x128xf32>
    tpu.vector_store %arg6[%c0_52, %c0_53, %c0_54], %60 {strides = array<i32>} : memref<1x16x128xf32, #tpu.memory_space<vmem>>, vector<1x16x128xf32>,
    return
  }
  func.func @transform_0(%arg0: i32) -> (i32, i32, i32) {
    %c0_i32 = arith.constant 0 : i32
    %c0_i32_0 = arith.constant 0 : i32
    %c0_i32_1 = arith.constant 0 : i32
    return %arg0, %c0_i32, %c0_i32_0 : i32, i32, i32
  }
  func.func @transform_1(%arg0: i32) -> (i32, i32, i32) {
    %c0_i32 = arith.constant 0 : i32
    %c0_i32_0 = arith.constant 0 : i32
    %c0_i32_1 = arith.constant 0 : i32
    %c0_i32_2 = arith.constant 0 : i32
    return %c0_i32, %c0_i32_0, %c0_i32_1 : i32, i32, i32
  }
  func.func @transform_2(%arg0: i32) -> (i32, i32) {
    %c0_i32 = arith.constant 0 : i32
    %c0_i32_0 = arith.constant 0 : i32
    %c0_i32_1 = arith.constant 0 : i32
    return %c0_i32, %c0_i32_0 : i32, i32
  }
  func.func @transform_3(%arg0: i32) -> (i32, i32, i32) {
    %c0_i32 = arith.constant 0 : i32
    %c0_i32_0 = arith.constant 0 : i32
    %c0_i32_1 = arith.constant 0 : i32
    %c0_i32_2 = arith.constant 0 : i32
    return %c0_i32, %c0_i32_0, %c0_i32_1 : i32, i32, i32
  }
  func.func @transform_4(%arg0: i32) -> (i32, i32) {
    %c0_i32 = arith.constant 0 : i32
    %c0_i32_0 = arith.constant 0 : i32
    %c0_i32_1 = arith.constant 0 : i32
    return %c0_i32, %c0_i32_0 : i32, i32
  }
  func.func @transform_5(%arg0: i32) -> (i32, i32, i32) {
    %c0_i32 = arith.constant 0 : i32
    %c0_i32_0 = arith.constant 0 : i32
    %c0_i32_1 = arith.constant 0 : i32
    return %arg0, %c0_i32, %c0_i32_0 : i32, i32, i32
  }
}

</mosaic_0001>

<bundles_post_ra>
// kernel: tpu_custom_call.1
= control target key start
LH: loop header
LB: loop body
LE: loop exit
PB: predicated region body
PF: predicated region fallthrough
CT: control target
= control target key end

     0   :  { %10 = vsyncpa [#allocation4], 0  ;;  %s1606_s0 = inlined_call_operand.hbm [shape: f32[2,16,128], index: 0, kind: input, shape index: {}]   ;;  %s1607_s1 = inlined_call_operand.hbm [shape: bf16[3,128,128], index: 1, kind: input, shape index: {}]   ;;  %s1608_s2 = inlined_call_operand.vmem [shape: f32[1,128], index: 2, kind: input, shape index: {}]   ;;  %s1609_s3 = inlined_call_operand.hbm [shape: bf16[3,128,128], index: 3, kind: input, shape index: {}]   ;;  %s1610_s4 = inlined_call_operand.vmem [shape: f32[1,128], index: 4, kind: input, shape index: {}]   ;;  %s1611_s5 = inlined_call_operand.hbm [shape: f32[2,16,128], index: 5, kind: output, shape index: {}]  }
   0x1   :  { %12 = vsyncpa [#allocation4 + $0x1], 0 }
   0x2   :  { %13 = vsyncpa [#allocation7], 0 }
   0x3   :  { %14 = vsyncpa [#allocation5], 0 }
   0x4   :  { %16 = vsyncpa [#allocation5 + $0x1], 0  ;;  %s1445_s18 = smov 0   ;;  %s1447_s19 = smov 0  }
   0x5   :  { %s1449_s20 = smov 0   ;;  %s1451_s21 = smov 0  }
   0x6 LB: > { %s1466_s22 = sadd.s32 4294967295, %s1404_s21   ;;  %s908_s23 = sadd.s32 4294967294, %s1404_s21   ;;  %s1404_s21 = sphi %s1451_s21, %s1621_s21   ;;  %s1400_s20 = sphi %s1449_s20, %s1620_s20   ;;  %s1396_s19 = sphi %s1447_s19, %s1619_s19   ;;  %s1392_s18 = sphi %s1445_s18, %s1618_s18  }
   0x7   : > { %p42_p0 = scmp.ne.s32.totalorder %s1396_s19, %s1392_s18  ;;  %p43_p1 = scmp.eq.s32.totalorder %s1466_s22, 0 }
   0x8   : > { %p150_p2 = scmp.eq.s32.totalorder %s1466_s22, 1  ;;  %p156_p3 = scmp.eq.s32.totalorder %s908_s23, 1 }
   0x9   : > { %p1475_p4 = por %p43_p1, %p42_p0  ;;  %p909_p5 = scmp.ge.s32.totalorder %s1404_s21, 1 }
   0xa   : > { %p1480_p6 = por %p156_p3, %p42_p0  ;;  %p163_p7 = scmp.lt.s32.totalorder %s1404_s21, 3 }
   0xb   : > { %s174_s28 = sshll.u32 %s1607_s1, 4  ;;  %s1406_s30 = smov [#allocation6]   ;;  %s175_s28 = int_to_ptr.hbm [resolvable:$true] %s174_s28 }
   0xc   : > { %p1488_p8 = pnand %p909_p5, %p163_p7  ;;  %s176_s6 = sshll.u32 %s1406_s30, 4  ;;  %s177_s6 = int_to_ptr.vmem [resolvable:$true] %s176_s6 }
   0xd   : > { %s191_s9 = sshll.u32 %s1609_s3, 4  ;;  %s1407_s10 = smov 64   ;;  %s192_s9 = int_to_ptr.hbm [resolvable:$true] %s191_s9 }
   0xe   : > { %p1180_p9 = pneg %p1488_p8  ;;  %s1408_s11 = smov 4  }
   0xf   : > { %s1409_s12 = smov [#allocation8]   ;;  %s1501_s14 = sadd.s32 1, %s1404_s21  }
  0x10   : > { %p1181_p10 = pnand %p1180_p9, %p43_p1  ;;  %s193_s13 = sshll.u32 %s1409_s12, 4  ;;  %s194_s13 = int_to_ptr.vmem [resolvable:$true] %s193_s13 }
  0x11   : > { %s29_s15 = sadd.s32 1, %s1400_s20  ;;  %s26_s16 = ssub.s32 %s1404_s21, %s1501_s14 }
  0x12   : > { %1183 = dma.hbm_to_vmem [thread:$0]  (!%p1181_p10), %s175_s28, 3072, %s177_s6, [#allocation7], %s1407_s10, %s1407_s10, %s1408_s11  }
  0x13   : > { %1186 = dma.hbm_to_vmem [thread:$0]  (!%p1181_p10), %s192_s9, 3072, %s194_s13, [#allocation7], %s1407_s10, %s1407_s10, %s1408_s11  }
  0x14   : > { %p36_p12 = scmp.ne.s32.totalorder %s1400_s20, %s1396_s19  ;;  %p27_p13 = scmp.eq.s32.totalorder %s26_s16, 0 }
  0x15   : > { %p37_p0 = scmp.eq.s32.totalorder %s1404_s21, 0  ;;  %p1197_p5 = scmp.lt.s32.totalorder %s1404_s21, 2 }
  0x16   : > { %p1511_p3 = por %p150_p2, %p36_p12  ;;  %s210_s26 = sand.u32 1, %s1400_s20  }
  0x17   : > { %s1517_s23 = scalar_select %p27_p13, %s1400_s20, %s29_s15  }
  0x18   : > { %p38_p7 = por %p37_p0, %p36_p12  ;;  %s913_s27 = sshll.u32 %s210_s26, 4 }
  0x19   : > { %s1118_s28 = sshll.u32 %s1404_s21, 4  ;;  %s214_s8 = scalar_lea.vmem [#allocation3], %s913_s27 }
  0x1a   : > { %s219_s7 = scalar_lea.hbm %s1606_s0, %s1118_s28  ;;  %s222_s9 = sshll.u32 %s214_s8, 4  ;;  %s223_s9 = int_to_ptr.vmem [resolvable:$true] %s222_s9 }
  0x1b   : > { %s220_s10 = sshll.u32 %s219_s7, 4  ;;  %p1524_p2 = pnand %p1197_p5, %p38_p7  ;;  %s221_s10 = int_to_ptr.hbm [resolvable:$true] %s220_s10 }
  0x1c   : > { %s211_s12 = scalar_lea.sflag [#allocation4], %s210_s26  ;;  %s1304_s13 = sshra.s32 %s221_s10, 4  ;;  %s1305_s13 = int_to_ptr.hbm [resolvable:$true] %s1304_s13 }
  0x1d   : > { %s1306_s15 = scalar_lea.hbm %s1305_s13, 16  ;;  %p1308_p10 = pneg %p1524_p2 }
  0x1e   : > { %p1307_p9 = scmp.ne.s32.totalorder %s1305_s13, %s1306_s15  ;;  %s1311_s28 = scalar_lea.hbm %s1606_s0, 32 }
  0x1f   : > { %p1312_p0 = scmp.lt.s32.totalorder %s1305_s13, %s1606_s0  ;;  %p1313_p5 = scmp.lt.s32.totalorder %s1311_s28, %s1306_s15 }
  0x20   : > { %p1309_p12 = pnand %p1308_p10, %p1307_p9 }
  0x21   : > { %p1314_p7 = por %p1313_p5, %p1312_p0 }
  0x22   : > { %p1310_p13 = pneg %p1309_p12 }
  0x24   : > { %p1315_p11 = pnand %p1314_p7, %p1310_p13 }
  0x26   : > { %1318 = shalt.err (!%p1315_p11)
}
  0x27   : > { %s1410_s26 = smov 128   ;;  %s1411_s7 = smov 8  }
  0x28   : > { %1190 = dma.hbm_to_vmem [thread:$0]  (!%p1524_p2), %s221_s10, 256, %s223_s9, %s211_s12, %s1410_s26, %s1410_s26, %s1411_s7  }
  0x29   : > { %234 = sbr.rel (%p1488_p8) target bundleno = 387 (0x183), region = 40  ;;  %s1541_s8 = sand.u32 (!%p1488_p8), 1, %s1396_s19  }
  0x2a   : > { %s917_s13 = sshll.u32 (!%p1488_p8), %s1541_s8, 4  ;;  %s237_s15 = scalar_lea.sflag (!%p1488_p8), [#allocation4], %s1541_s8 }
  0x2b   : > { %s240_s16 = scalar_lea.vmem (!%p1488_p8), [#allocation3], %s917_s13 }
  0x2e   : > { %1379 = dma.done.wait (%p1475_p4), %s237_s15, 256  }
  0x2f   : > { %1381 = vsyncadd (%p1475_p4), %s237_s15, 4294967040 }
  0x30   : > { %1383 = dma.done.wait (%p43_p1), [#allocation7], 6144  }
  0x31   : > { %1385 = vsyncadd (%p43_p1), [#allocation7], 4294961152  ;;  %v1412_v0 = vmov 0.0   ;;  %v1134_v1 = vld [vmem:[#allocation6 + $0x78] sm:$0xff]  ;;  %v1133_v4 = vld [vmem:[#allocation6 + $0x70] sm:$0xff]  ;;  %s1167_s11 = sshll.u32 %s1466_s22, 4 }
  0x32   : > { %278 = vst [vmem:[#allocation2] sm:$0x1] %v1412_v0  ;;  %v1126_v2 = vld [vmem:[#allocation6 + $0x38] sm:$0xff]  ;;  %371 = vmatpush.bf16.msra.mxu0 %v1134_v1  ;;  %v1125_v5 = vld [vmem:[#allocation6 + $0x30] sm:$0xff]  ;;  %v1132_v7 = vld [vmem:[#allocation6 + $0x68] sm:$0xff]  ;;  %s812_s28 = scalar_lea.hbm %s1611_s5, %s1167_s11  ;;  %s277_s30 = scalar_lea.vmem [#allocation9], %s917_s13 }
  0x33   : > { %279 = vst [vmem:[#allocation2 + $0x11] sm:$0x1] %v1412_v0  ;;  %v1142_v3 = vld [vmem:[#allocation6 + $0xb8] sm:$0xff]  ;;  %433 = vmatpush.bf16.msra.mxu1 %v1126_v2  ;;  %v1141_v6 = vld [vmem:[#allocation6 + $0xb0] sm:$0xff]  ;;  %v1124_v8 = vld [vmem:[#allocation6 + $0x28] sm:$0xff]  ;;  %s813_s6 = sshll.u32 %s277_s30, 4  ;;  %s814_s6 = int_to_ptr.vmem [resolvable:$true] %s813_s6 }
  0x34   : > { %515 = vmatpush.bf16.msra.mxu2 %v1142_v3  ;;  %v1140_v9 = vld [vmem:[#allocation6 + $0xa8] sm:$0xff]  ;;  %v1555_v10 = vld [vmem:[%s240_s16] sm:$0xff]  ;;  %v1130_v15 = vld [vmem:[#allocation6 + $0x58] sm:$0xff]  ;;  %s815_s26 = sshll.u32 %s812_s28, 4  ;;  %s801_s22 = scalar_lea.sflag [#allocation5], %s1541_s8  ;;  %s816_s26 = int_to_ptr.hbm [resolvable:$true] %s815_s26 }
  0x35   : > { %v1557_v11 = vld [vmem:[%s240_s16 + $0x8] sm:$0xff]  ;;  %282 = vst [vmem:[#allocation2 + $0x1] sm:$0xff] %v1555_v10  ;;  %v1131_v12 = vld [vmem:[#allocation6 + $0x60] sm:$0xff]  ;;  %v1129_v18 = vld [vmem:[#allocation6 + $0x50] sm:$0xff]  ;;  %s1348_s7 = sshra.s32 %s816_s26, 4  ;;  %s1354_s24 = scalar_lea.hbm %s1611_s5, 32  ;;  %s1349_s7 = int_to_ptr.hbm [resolvable:$true] %s1348_s7 }
  0x36   : > { %372 = vmatpush.bf16.msra.mxu0 %v1133_v4  ;;  %v1123_v13 = vld [vmem:[#allocation6 + $0x20] sm:$0xff]  ;;  %283 = vst [vmem:[#allocation2 + $0x9] sm:$0xff] %v1557_v11  ;;  %v1122_v16 = vld [vmem:[#allocation6 + $0x18] sm:$0xff]  ;;  %v1121_v19 = vld [vmem:[#allocation6 + $0x10] sm:$0xff]  ;;  %v305_v31 = vpack.c.bf16 %v1557_v11, %v1555_v10  ;;  %s1350_s15 = scalar_lea.hbm %s1349_s7, 16  ;;  %p1355_p11 = scmp.lt.s32.totalorder %s1349_s7, %s1611_s5 }
  0x37   : > { %434 = vmatpush.bf16.msra.mxu1 %v1125_v5  ;;  %v1139_v14 = vld [vmem:[#allocation6 + $0xa0] sm:$0xff]  ;;  %v1138_v17 = vld [vmem:[#allocation6 + $0x98] sm:$0xff]  ;;  %v1137_v20 = vld [vmem:[#allocation6 + $0x90] sm:$0xff]  ;;  %p1351_p1 = scmp.ne.s32.totalorder %s1349_s7, %s1350_s15  ;;  %p1356_p2 = scmp.lt.s32.totalorder %s1354_s24, %s1350_s15 }
  0x38   : > { %516 = vmatpush.bf16.msra.mxu2 %v1141_v6  ;;  %v1128_v21 = vld [vmem:[#allocation6 + $0x48] sm:$0xff]  ;;  %v1127_v24 = vld [vmem:[#allocation6 + $0x40] sm:$0xff]  ;;  %v1158_v34 = vld [vmem:[#allocation8 + $0x78] sm:$0xff] }
  0x39   : > { %v1120_v22 = vld [vmem:[#allocation6 + $0x8] sm:$0xff]  ;;  %v1119_v25 = vld [vmem:[#allocation6] sm:$0xff]  ;;  %630 = vmatpush.bf16.msra.mxu3 %v1158_v34  ;;  %v1157_v35 = vld [vmem:[#allocation8 + $0x70] sm:$0xff]  ;;  %p1352_p4 = pnand %p1351_p1, %p1511_p3  ;;  %p1357_p9 = por %p1356_p2, %p1355_p11 }
  0x3a   : > { %373 = vmatpush.bf16.msra.mxu0 %v1132_v7  ;;  %v1136_v23 = vld [vmem:[#allocation6 + $0x88] sm:$0xff]  ;;  %v1135_v28 = vld [vmem:[#allocation6 + $0x80] sm:$0xff]  ;;  %v1150_v36 = vld [vmem:[#allocation8 + $0x38] sm:$0xff] }
  0x3b   : > { %435 = vmatpush.bf16.msra.mxu1 %v1124_v8  ;;  %v1166_v37 = vld [vmem:[#allocation8 + $0xb8] sm:$0xff]  ;;  %v1156_v38 = vld [vmem:[#allocation8 + $0x68] sm:$0xff]  ;;  %v1149_v39 = vld [vmem:[#allocation8 + $0x30] sm:$0xff]  ;;  %p1353_p8 = pneg %p1352_p4 }
  0x3c   : > { %517 = vmatpush.bf16.msra.mxu2 %v1140_v9  ;;  %v284_v26 = vld [vmem:[#allocation2] sm:$0xff]  ;;  %v1165_v40 = vld [vmem:[#allocation8 + $0xb0] sm:$0xff]  ;;  %v1155_v41 = vld [vmem:[#allocation8 + $0x60] sm:$0xff] }
  0x3d   : > { %v285_v27 = vld [vmem:[#allocation2 + $0x8] sm:$0xff]  ;;  %631 = vmatpush.bf16.msra.mxu3 %v1157_v35  ;;  %v1148_v42 = vld [vmem:[#allocation8 + $0x28] sm:$0xff]  ;;  %v1154_v44 = vld [vmem:[#allocation8 + $0x58] sm:$0xff]  ;;  %p1358_p10 = pnand %p1357_p9, %p1353_p8 }
  0x3e   : > { %374 = vmatpush.bf16.msra.mxu0 %v1131_v12  ;;  %v447_v29 = vld [vmem:[#allocation2 + $0x2] sm:$0xff]  ;;  %v448_v30 = vld [vmem:[#allocation2 + $0xa] sm:$0xff]  ;;  %v286_v32 = vpack.c.bf16 %v285_v27, %v284_v26  ;;  %v1147_v45 = vld [vmem:[#allocation8 + $0x20] sm:$0xff] }
  0x3f   : > { %436 = vmatpush.bf16.msra.mxu1 %v1123_v13  ;;  %v449_v33 = vpack.c.bf16 %v448_v30, %v447_v29  ;;  %v1164_v43 = vld [vmem:[#allocation8 + $0xa8] sm:$0xff]  ;;  %v1163_v46 = vld [vmem:[#allocation8 + $0xa0] sm:$0xff]  ;;  %v1153_v47 = vld [vmem:[#allocation8 + $0x50] sm:$0xff] }
  0x40   : > { %518 = vmatpush.bf16.msra.mxu2 %v1139_v14  ;;  %v1146_v48 = vld [vmem:[#allocation8 + $0x18] sm:$0xff]  ;;  %v1152_v50 = vld [vmem:[#allocation8 + $0x48] sm:$0xff]  ;;  %v1145_v51 = vld [vmem:[#allocation8 + $0x10] sm:$0xff] }
  0x41   : > { %632 = vmatpush.bf16.msra.mxu3 %v1156_v38  ;;  %v1162_v49 = vld [vmem:[#allocation8 + $0x98] sm:$0xff]  ;;  %v1161_v52 = vld [vmem:[#allocation8 + $0x90] sm:$0xff]  ;;  %v1151_v53 = vld [vmem:[#allocation8 + $0x40] sm:$0xff] }
  0x42   : > { %375 = vmatpush.bf16.msra.mxu0 %v1130_v15  ;;  %v1144_v54 = vld [vmem:[#allocation8 + $0x8] sm:$0xff]  ;;  %v1143_v56 = vld [vmem:[#allocation8] sm:$0xff] }
  0x43   : > { %437 = vmatpush.bf16.msra.mxu1 %v1122_v16  ;;  %v1160_v55 = vld [vmem:[#allocation8 + $0x88] sm:$0xff]  ;;  %v1159_v57 = vld [vmem:[#allocation8 + $0x80] sm:$0xff] }
  0x44   : > { %519 = vmatpush.bf16.msra.mxu2 %v1138_v17  ;;  %v1242_v61 = vld [vmem:[%s1608_s2] ss:$0 sm:$0xff] }
  0x45   : > { %633 = vmatpush.bf16.msra.mxu3 %v1155_v41 }
  0x46   : > { %376 = vmatpush.bf16.msra.mxu0 %v1129_v18 }
  0x47   : > { %438 = vmatpush.bf16.msra.mxu1 %v1121_v19 }
  0x48   : > { %520 = vmatpush.bf16.msra.mxu2 %v1137_v20 }
  0x49   : > { %634 = vmatpush.bf16.msra.mxu3 %v1154_v44 }
  0x4a   : > { %377 = vmatpush.bf16.msra.mxu0 %v1128_v21 }
  0x4b   : > { %439 = vmatpush.bf16.msra.mxu1 %v1120_v22 }
  0x4c   : > { %521 = vmatpush.bf16.msra.mxu2 %v1136_v23 }
  0x4d   : > { %635 = vmatpush.bf16.msra.mxu3 %v1153_v47 }
  0x4e   : > { %378 = vmatpush.bf16.msra.mxu0 %v1127_v24  ;;  %v1243_v24 = vld [vmem:[%s1610_s4] ss:$0 sm:$0xff] }
  0x4f   : > { %440 = vmatpush.bf16.msra.mxu1 %v1119_v25 }
  0x50   : > { %522 = vmatpush.bf16.msra.mxu2 %v1135_v28 }
  0x51   : > { %379 = vmatmul.bf16.vlgmr.msra.gmra.mxu0 %v305_v31  ;;  %636 = vmatpush.bf16.msra.mxu3 %v1152_v50 }
  0x52   : > { %441 = vmatmul.bf16.vlgmr.msra.gmra.mxu1 %v286_v32  ;;  %692 = vmatpush.bf16.msrb.mxu0 %v1150_v36 }
  0x53   : > { %523 = vmatmul.bf16.vlgmr.msra.gmra.mxu2 %v449_v33  ;;  %774 = vmatpush.bf16.msrb.mxu1 %v1166_v37 }
  0x55   : > { %637 = vmatpush.bf16.msra.mxu3 %v1151_v53 }
  0x56   : > { %693 = vmatpush.bf16.msrb.mxu0 %v1149_v39 }
  0x57   : > { %775 = vmatpush.bf16.msrb.mxu1 %v1165_v40 }
  0x5a   : > { %694 = vmatpush.bf16.msrb.mxu0 %v1148_v42 }
  0x5b   : > { %776 = vmatpush.bf16.msrb.mxu1 %v1164_v43 }
  0x5e   : > { %695 = vmatpush.bf16.msrb.mxu0 %v1147_v45 }
  0x5f   : > { %777 = vmatpush.bf16.msrb.mxu1 %v1163_v46 }
  0x62   : > { %696 = vmatpush.bf16.msrb.mxu0 %v1146_v48 }
  0x63   : > { %778 = vmatpush.bf16.msrb.mxu1 %v1162_v49 }
  0x66   : > { %697 = vmatpush.bf16.msrb.mxu0 %v1145_v51 }
  0x67   : > { %779 = vmatpush.bf16.msrb.mxu1 %v1161_v52 }
  0x6a   : > { %698 = vmatpush.bf16.msrb.mxu0 %v1144_v54 }
  0x6b   : > { %780 = vmatpush.bf16.msrb.mxu1 %v1160_v55 }
  0x6e   : > { %699 = vmatpush.bf16.msrb.mxu0 %v1143_v56 }
  0x6f   : > { %781 = vmatpush.bf16.msrb.mxu1 %v1159_v57 }
  0xce   : > { %v380_v58 = vpop.f32.mrf.mxu0 }
  0xcf   : > { %v442_v59 = vpop.f32.mrf.mxu1 }
  0xd0   : > { %v443_v60 = vadd.f32 %v442_v59, %v380_v58 }
  0xd6   : > { %v524_v62 = vpop.f32.mrf.mxu2  ;;  %v382_v1 = vpop.f32.mrf.mxu0 }
  0xd7   : > { %v529_v63 = vadd.f32 %v524_v62, %v443_v60  ;;  %v444_v2 = vpop.f32.mrf.mxu1 }
  0xd8   : > { %v445_v5 = vadd.f32 %v444_v2, %v382_v1 }
  0xd9   : > { %v535_v0 = vadd.f32 %v1242_v61, %v529_v63 }
  0xdb   : > { %v537_v3 = vmul.f32 0.1, %v535_v0 }
  0xdd   : > { %v539_v4 = vmax.f32 %v535_v0, %v537_v3 }
  0xde   : > { %v526_v6 = vpop.f32.mrf.mxu2 }
  0xdf   : > { %541 = vst [vmem:[#allocation2 + $0x1] sm:$0xff] %v539_v4  ;;  %v530_v7 = vadd.f32 %v526_v6, %v445_v5 }
  0xe1   : > { %v536_v8 = vadd.f32 %v1242_v61, %v530_v7 }
  0xe3   : > { %v538_v9 = vmul.f32 0.1, %v536_v8 }
  0xe5   : > { %v540_v12 = vmax.f32 %v536_v8, %v538_v9 }
  0xe6   : > { %v543_v14 = vld [vmem:[#allocation2] sm:$0xff] }
  0xe7   : > { %542 = vst [vmem:[#allocation2 + $0x9] sm:$0xff] %v540_v12  ;;  %v564_v13 = vpack.c.bf16 %v540_v12, %v539_v4 }
  0xe9   : > { %638 = vmatmul.bf16.vlgmr.msra.gmra.mxu3 %v564_v13 }
  0xee   : > { %v544_v15 = vld [vmem:[#allocation2 + $0x8] sm:$0xff] }
  0xef   : > { %v706_v16 = vld [vmem:[#allocation2 + $0x2] sm:$0xff]  ;;  %v707_v17 = vld [vmem:[#allocation2 + $0xa] sm:$0xff]  ;;  %v545_v18 = vpack.c.bf16 %v544_v15, %v543_v14 }
  0xf0   : > { %v708_v19 = vpack.c.bf16 %v707_v17, %v706_v16 }
  0xf1   : > { %700 = vmatmul.bf16.vlgmr.msrb.gmra.mxu0 %v545_v18 }
  0xf2   : > { %782 = vmatmul.bf16.vlgmr.msrb.gmra.mxu1 %v708_v19 }
 0x16c   : > { %v639_v20 = vpop.f32.mrf.mxu3 }
 0x16e   : > { %v701_v21 = vpop.f32.mrf.mxu0 }
 0x16f   : > { %v783_v22 = vpop.f32.mrf.mxu1  ;;  %v702_v23 = vadd.f32 %v701_v21, %v639_v20 }
 0x171   : > { %v788_v25 = vadd.f32 %v783_v22, %v702_v23 }
 0x173   : > { %v794_v26 = vadd.f32 %v1243_v24, %v788_v25 }
 0x174   : > { %v641_v29 = vpop.f32.mrf.mxu3 }
 0x175   : > { %v796_v27 = vadd.f32 %v794_v26, %v1555_v10 }
 0x176   : > { %v703_v28 = vpop.f32.mrf.mxu0 }
 0x177   : > { %798 = vst [vmem:[%s277_s30] sm:$0xff] %v796_v27  ;;  %v704_v30 = vadd.f32 %v703_v28, %v641_v29  ;;  %v785_v31 = vpop.f32.mrf.mxu1 }
 0x179   : > { %v789_v32 = vadd.f32 %v785_v31, %v704_v30 }
 0x17b   : > { %v795_v33 = vadd.f32 %v1243_v24, %v789_v32 }
 0x17d   : > { %v797_v10 = vadd.f32 %v795_v33, %v1557_v11 }
 0x17f   : > { %799 = vst [vmem:[%s277_s30 + $0x8] sm:$0xff] %v797_v10 }
 0x180   : > { %1361 = shalt.err (!%p1358_p10)
}
 0x181   : > { %s1413_s8 = smov 128   ;;  %s1414_s10 = smov 8  }
 0x182   : > { %1178 = dma.vmem_to_hbm [thread:$0]  (%p1511_p3), %s814_s6, 256, %s816_s26, %s801_s22, %s1413_s8, %s1413_s8, %s1414_s10  }
 0x183 PF: > { %s830_s11 = sand.u32 1, %s1392_s18   ;;  %p1617_p12 = scmp.ge.s32.totalorder %s1404_s21, 2 }
 0x184   : > { %s831_s12 = scalar_lea.sflag [#allocation5], %s830_s11 }
 0x185   : > { %p1192_p13 = pnand %p1617_p12, %p1480_p6 }
 0x187   : > { %p1193_p0 = pneg %p1192_p13 }
 0x189   : > { %1387 = dma.done.wait (%p1193_p0), %s831_s12, 256  }
 0x18a   : > { %1389 = vsyncadd (%p1193_p0), %s831_s12, 4294967040  ;;  %p19_p5 = scmp.ge.s32.totalorder %s1501_s14, 4   ;;  %s1618_s18 = smov %s1396_s19 }
 0x18b   : > { %s1619_s19 = smov %s1400_s20  ;;  %s1620_s20 = smov %s1517_s23 }
 0x18c   : > { %s1621_s21 = smov %s1501_s14  ;;  %21 = sbr.rel (!%p19_p5) target bundleno = 6 (0x6), region = 97 }
 0x191   :  { %837 = vsyncpa [#allocation4], 1 }
 0x192   :  { %839 = vsyncpa [#allocation4 + $0x1], 1 }
 0x193   :  { %840 = vsyncpa [#allocation7], 1 }
 0x194   :  { %841 = vsyncpa [#allocation5], 1 }
 0x195   :  { %843 = vsyncpa [#allocation5 + $0x1], 1 }

</bundles_post_ra>
